<compile_context>
chip_gen: v5e
topology: v5e:2x2
jax: 0.10.0
libtpu: 0.0.40
codegen_flags: <defaults>
</compile_context>

<pallas_src>
import jax
import jax.numpy as jnp
from jax.experimental import pallas as pl
from jax.experimental.pallas import tpu as pltpu


def add_bias_kernel(x_ref, b_ref, o_ref):
    # x_ref: (tile_r, tile_c), b_ref: (1, tile_c) -> pure VPU broadcast add,
    # lane-dense store. jnp promotion handles mixed input dtypes.
    o_ref[...] = (x_ref[...] + b_ref[...]).astype(o_ref.dtype)


def _round_down(v, m):
    return (v // m) * m


def _round_up(v, m):
    return -(-v // m) * m


def _default_target_block_bytes():
    # Byte-targeted tiles: faster-HBM chips need bigger blocks so the fixed
    # ~0.35us per-grid-step overhead stays well below the DMA time.
    try:
        kind = jax.devices()[0].device_kind.lower()
    except Exception:
        kind = ""
    if "v7" in kind:
        return 4 << 20   # ~3.2 TB/s HBM, but only 64 MiB physical VMEM
    if "v6" in kind:
        return 3 << 20   # ~1.4 TB/s HBM
    return 2 << 20       # v5e (~0.8 TB/s, 16 MiB default scoped VMEM) / unknown


def add_bias_forward(x, bias_param, *, target_block_bytes=None):
    """x: (..., C); bias_param: (C, 1) (PyTorch nn.Parameter storage).

    Returns x + bias broadcast over the last axis, with PyTorch-style type
    promotion (e.g. bf16 x + f32 bias -> f32 result).
    """
    orig_shape = x.shape
    C = orig_shape[-1]
    assert bias_param.shape == (C, 1), bias_param.shape

    # PyTorch forward: self._bias.t().view(1, -1) -> (1, C) row (lane-dense).
    bias2d = bias_param.reshape(1, C)

    # Flatten leading dims: rows -> sublanes, features -> lanes.
    x2d = x.reshape(-1, C)
    B = x2d.shape[0]

    out_dtype = jnp.promote_types(x.dtype, bias_param.dtype)
    in_item = jnp.dtype(x.dtype).itemsize
    out_item = jnp.dtype(out_dtype).itemsize
    bias_item = jnp.dtype(bias_param.dtype).itemsize
    budget_item = max(in_item, out_item)

    if target_block_bytes is None:
        target_block_bytes = _default_target_block_bytes()

    # Sublane pack of the input dtype: 8 (32-bit), 16 (bf16/f16), 32 (int8/fp8).
    pack = max(8, 32 // in_item)

    row_bytes = C * budget_item
    if B * row_bytes <= target_block_bytes:
        # Whole array in one block: full dims -> no (8,128) constraint, no mask.
        tile_r, tile_c = B, C
    elif row_bytes * pack <= target_block_bytes:
        # Tile rows only; keep the full (lane-dense) feature dim per block.
        # Here B > pack is guaranteed, so tile_r < B.
        tile_r = max(pack, _round_down(target_block_bytes // row_bytes, pack))
        tile_c = C
    else:
        # Very wide feature dim: also tile C in multiples of 128 so blocks
        # (and their double buffers) stay within the VMEM budget everywhere.
        tile_c = max(128, _round_down(target_block_bytes // (pack * budget_item), 128))
        tile_c = min(tile_c, _round_up(C, 128))
        tile_r = max(pack, _round_down(target_block_bytes // (tile_c * budget_item), pack))

    # No pad / no trailing slice: cdiv grid, Pallas masks the ragged last block.
    # OOB tail rows are read (garbage) but never stored -> safe for an
    # elementwise add.
    grid = (pl.cdiv(B, tile_r), pl.cdiv(C, tile_c))

    # VMEM actually live: double-buffered input + output blocks + tiny bias.
    live_bytes = 2 * tile_r * tile_c * (in_item + out_item) + 2 * tile_c * bias_item
    vmem_limit = int(min(48 << 20, max(32 << 20, live_bytes + (4 << 20))))

    cost = pl.CostEstimate(
        flops=B * C,
        transcendentals=0,
        bytes_accessed=B * C * (in_item + out_item) + C * bias_item,
    )

    out = pl.pallas_call(
        add_bias_kernel,
        out_shape=jax.ShapeDtypeStruct((B, C), out_dtype),
        grid_spec=pltpu.PrefetchScalarGridSpec(
            num_scalar_prefetch=0,
            grid=grid,
            in_specs=[
                # activations: tiled over (flattened batch, features)
                pl.BlockSpec((tile_r, tile_c), lambda i, j: (i, j)),
                # bias: tiny; only re-fetched when the C-block changes
                pl.BlockSpec((1, tile_c), lambda i, j: (0, j)),
            ],
            out_specs=pl.BlockSpec((tile_r, tile_c), lambda i, j: (i, j)),
        ),
        compiler_params=pltpu.CompilerParams(
            # Elementwise-independent tiles on both axes -> megacore sharding.
            dimension_semantics=("parallel", "parallel"),
            vmem_limit_bytes=vmem_limit,
        ),
        cost_estimate=cost,
    )(x2d, bias2d)

    # TODO(synk): if this bias-add sits next to a matmul in the real model,
    # fuse it as that kernel's epilogue instead of a standalone HBM round trip.
    return out.reshape(orig_shape)


def add_bias_reference(x, bias_param):
    """Plain-JAX reference matching the PyTorch forward (incl. promotion)."""
    return x + bias_param.reshape(1, -1)


if __name__ == "__main__":
    key = jax.random.PRNGKey(0)
    k_x, k_b, k_x2 = jax.random.split(key, 3)

    # Small shapes consistent with the module: x (..., C), bias stored (C, 1).
    B_lead, T, C = 2, 9, 32          # 2*9 = 18 flattened rows (not 8-aligned)
    x = jax.random.normal(k_x, (B_lead, T, C), dtype=jnp.float32)
    bias = jax.random.normal(k_b, (C,), dtype=jnp.float32)
    bias_param = bias[:, None]       # mirrors nn.Parameter(bias.unsqueeze(1)) -> (C, 1)

    out = jax.block_until_ready(add_bias_forward(x, bias_param))
    ref = add_bias_reference(x, bias_param)
    assert out.shape == x.shape, out.shape
    assert out.dtype == ref.dtype, (out.dtype, ref.dtype)
    assert jnp.allclose(out, ref, atol=1e-6, rtol=1e-6), "mismatch vs reference (f32)"

    # Mixed-precision: bf16 activations + f32 parameter -> f32 (PyTorch promotion).
    x_bf = jax.random.normal(k_x2, (16, C), dtype=jnp.bfloat16)
    out_bf = jax.block_until_ready(add_bias_forward(x_bf, bias_param))
    ref_bf = add_bias_reference(x_bf, bias_param)
    assert out_bf.dtype == ref_bf.dtype, (out_bf.dtype, ref_bf.dtype)
    assert jnp.allclose(out_bf, ref_bf, atol=1e-2, rtol=1e-2), "mismatch vs reference (bf16)"

    print("KERNEL_OK")
</pallas_src>

<mosaic_0001>
module attributes {stable_mosaic.version = 11 : i64} {
  func.func @add_bias_kernel(%arg0: i32, %arg1: i32, %arg2: memref<18x32xf32, #tpu.memory_space<vmem>>, %arg3: memref<1x32xf32, #tpu.memory_space<vmem>>, %arg4: memref<18x32xf32, #tpu.memory_space<vmem>>) attributes {dimension_semantics = [#tpu.dimension_semantics<parallel>, #tpu.dimension_semantics<parallel>], iteration_bounds = array<i64: 1, 1>, scalar_prefetch = 0 : i64, scratch_operands = 0 : i64, tpu.core_type = #tpu.core_type<tc>, window_params = [{transform_indices = @transform_0, window_bounds = array<i64: 18, 32>}, {transform_indices = @transform_1, window_bounds = array<i64: 1, 32>}, {transform_indices = @transform_2, window_bounds = array<i64: 18, 32>}]} {
    %c0 = arith.constant 0 : index
    %c0_0 = arith.constant 0 : index
    %0 = vector.load %arg2[%c0, %c0_0] : memref<18x32xf32, #tpu.memory_space<vmem>>, vector<18x32xf32>
    %c0_1 = arith.constant 0 : index
    %c0_2 = arith.constant 0 : index
    %1 = vector.load %arg3[%c0_1, %c0_2] : memref<1x32xf32, #tpu.memory_space<vmem>>, vector<1x32xf32>
    %2 = vector.broadcast %1 : vector<1x32xf32> to vector<18x32xf32>
    %3 = arith.addf %0, %2 : vector<18x32xf32>
    %c0_3 = arith.constant 0 : index
    %c0_4 = arith.constant 0 : index
    %4 = vector.load %arg4[%c0_3, %c0_4] : memref<18x32xf32, #tpu.memory_space<vmem>>, vector<18x32xf32>
    tpu.vector_store %arg4[%c0_3, %c0_4], %3 {strides = array<i32>} : memref<18x32xf32, #tpu.memory_space<vmem>>, vector<18x32xf32>,
    return
  }
  func.func @transform_0(%arg0: i32, %arg1: i32) -> (i32, i32) {
    %c0_i32 = arith.constant 0 : i32
    return %arg0, %arg1 : i32, i32
  }
  func.func @transform_1(%arg0: i32, %arg1: i32) -> (i32, i32) {
    %c0_i32 = arith.constant 0 : i32
    %c0_i32_0 = arith.constant 0 : i32
    return %c0_i32, %arg1 : i32, i32
  }
  func.func @transform_2(%arg0: i32, %arg1: i32) -> (i32, i32) {
    %c0_i32 = arith.constant 0 : i32
    return %arg0, %arg1 : i32, i32
  }
}

</mosaic_0001>

<bundles_post_ra>
// kernel: tpu_custom_call.1
= control target key start
LH: loop header
LB: loop body
LE: loop exit
PB: predicated region body
PF: predicated region fallthrough
CT: control target
= control target key end

     0   :  { %7 = vsyncpa [#allocation3], 0  ;;  %s196_s0 = inlined_call_operand.hbm [shape: f32[18,32], index: 0, kind: input, shape index: {}]   ;;  %s197_s1 = inlined_call_operand.hbm [shape: f32[1,32], index: 1, kind: input, shape index: {}]   ;;  %s198_s2 = inlined_call_operand.hbm [shape: f32[18,32], index: 2, kind: output, shape index: {}]  }
   0x1   :  { %8 = vsyncpa [#allocation6], 0 }
   0x2   :  { %9 = vsyncpa [#allocation4], 0  ;;  %s14_s11 = sshll.u32 %s196_s0, 4  ;;  %s161_s12 = smov [#allocation2]   ;;  %s15_s11 = int_to_ptr.hbm [resolvable:$true] %s14_s11 }
   0x3   :  { %s16_s13 = sshll.u32 %s161_s12, 4  ;;  %s28_s16 = sshll.u32 %s197_s1, 4  ;;  %s17_s13 = int_to_ptr.vmem [resolvable:$true] %s16_s13  ;;  %s29_s16 = int_to_ptr.hbm [resolvable:$true] %s28_s16 }
   0x4   :  { %s162_s17 = smov 128   ;;  %s163_s18 = smov 8  }
   0x5   :  { %22 = dma.hbm_to_vmem [thread:$0]  %s15_s11, 384, %s17_s13, [#allocation3], %s162_s17, %s162_s17, %s163_s18  }
   0x6   :  { %s164_s19 = smov [#allocation5]  }
   0x7   :  { %s30_s20 = sshll.u32 %s164_s19, 4  ;;  %s31_s20 = int_to_ptr.vmem [resolvable:$true] %s30_s20 }
   0x8   :  { %33 = dma.hbm_to_vmem [thread:$0]  %s29_s16, 16, %s31_s20, [#allocation6]  }
   0x9   :  { %155 = dma.done.wait [#allocation3], 384  }
   0xa   :  { %156 = vsyncadd [#allocation3], 4294966912 }
   0xb   :  { %157 = dma.done.wait [#allocation6], 16  }
   0xc   :  { %158 = vsyncadd [#allocation6], 4294967280  ;;  %v42_v0 = vld [vmem:[#allocation2] sm:$0xff]  ;;  %v82_v1 = vld [vmem:[#allocation5] ss:$0 sm:$0xff]  ;;  %vm52_vm0 = vcmask 261120  }
   0xd   :  { %v43_v2 = vld [vmem:[#allocation2 + $0x8] sm:$0xff]  ;;  %v44_v3 = vld [vmem:[#allocation2 + $0x10] sm:$0x3]  ;;  %s165_s0 = smov [#allocation7]   ;;  %s63_s23 = sshll.u32 %s198_s2, 4  ;;  %v49_v4 = vadd.f32 %v82_v1, %v42_v0  ;;  %vm55_vm1 = vcmask 254976   ;;  %s64_s23 = int_to_ptr.hbm [resolvable:$true] %s63_s23 }
   0xe   :  { %s61_s1 = sshll.u32 %s165_s0, 4  ;;  %v50_v5 = vadd.f32 %v82_v1, %v43_v2  ;;  %v51_v6 = vadd.f32 %v82_v1, %v44_v3  ;;  %s62_s1 = int_to_ptr.vmem [resolvable:$true] %s61_s1 }
   0xf   :  { %53 = vst.msk [vmem:[#allocation7] sm:$0xff] %vm52_vm0, %v49_v4 }
  0x10   :  { %54 = vst.msk [vmem:[#allocation7 + $0x8] sm:$0xff] %vm52_vm0, %v50_v5 }
  0x11   :  { %56 = vst.msk [vmem:[#allocation7 + $0x10] sm:$0x3] %vm55_vm1, %v51_v6 }
  0x12   :  { %69 = dma.vmem_to_hbm [thread:$0]  %s62_s1, 384, %s64_s23, [#allocation4], %s162_s17, %s162_s17, %s163_s18  }
  0x13   :  { %159 = dma.done.wait [#allocation4], 384  }
  0x14   :  { %160 = vsyncadd [#allocation4], 4294966912 }
  0x15   :  { %74 = vsyncpa [#allocation3], 1 }
  0x16   :  { %75 = vsyncpa [#allocation6], 1 }
  0x17   :  { %76 = vsyncpa [#allocation4], 1 }

</bundles_post_ra>
